<compile_context>
chip_gen: v5e
topology: v5e:2x2
jax: 0.10.0
libtpu: 0.0.40
codegen_flags: <defaults>
</compile_context>

<pallas_src>
import jax
import jax.numpy as jnp
from jax.experimental import pallas as pl
from jax.experimental.pallas import tpu as pltpu


def _round_up(v, m):
    return (v + m - 1) // m * m


def gcn_kernel(adj_ref, xs_ref, di_ref, w_ref, b_ref, o_ref, acc_ref):
    """Grid = (row_tiles, k_tiles); k (reduction over neighbors) is innermost.

    adj_ref : (tm, tk)       bf16   adjacency tile (raw, unnormalized)
    xs_ref  : (tk, F_in_p)   f32    column-scaled features  (d * X) k-tile
    di_ref  : (tm, 1)        f32    d_inv_sqrt row tile
    w_ref   : (F_in_p, F_out_p) f32 W^T (VMEM resident, tiny)
    b_ref   : (1, F_out_p)   f32    bias (VMEM resident)
    o_ref   : (tm, F_out_p)  f32    output row tile
    acc_ref : (tm, F_in_p)   f32    scratch accumulator for A @ (d*X)
    """
    k = pl.program_id(1)

    @pl.when(k == 0)
    def _init():
        acc_ref[...] = jnp.zeros_like(acc_ref)

    # --- graph aggregation: acc += adj_tile @ (d * X)_tile, f32 accumulate ---
    acc_ref[...] += jnp.dot(
        adj_ref[...].astype(jnp.float32),
        xs_ref[...],
        preferred_element_type=jnp.float32,
    )

    # --- epilogue on last k: row-scale, linear, bias, ReLU, single store -----
    @pl.when(k == pl.num_programs(1) - 1)
    def _epilogue():
        y = acc_ref[...] * di_ref[...]                       # (tm, F_in_p)
        z = jnp.dot(y, w_ref[...], preferred_element_type=jnp.float32)
        z = z + b_ref[...]
        o_ref[...] = jnp.maximum(z, 0.0).astype(o_ref.dtype)


def gcn_cov_forward(x, adj, weight, bias, *, block_m=256, block_k=256):
    """x: (N, F_in), adj: (N, N), weight: (F_out, F_in), bias: (F_out,)."""
    n, f_in = x.shape
    f_out = weight.shape[0]

    x = x.astype(jnp.float32)
    adj = adj.astype(jnp.float32)

    # --- hoisted symmetric degree normalization (torch-equivalent) -----------
    deg = adj.sum(axis=1)
    d_inv_sqrt = deg ** -0.5
    d_inv_sqrt = jnp.where(jnp.isinf(d_inv_sqrt), 0.0, d_inv_sqrt)

    # Factored form: A_norm @ X == d * (A @ (d * X)).  Column-scale X once.
    xs = x * d_inv_sqrt[:, None]                             # (N, F_in) f32

    # --- pad to TPU-friendly shapes ------------------------------------------
    f_in_p = _round_up(f_in, 128)
    f_out_p = _round_up(f_out, 128)
    tm = min(block_m, _round_up(n, 8))       # row tile  (sublane multiple of 8)
    tk = min(block_k, _round_up(n, 128))     # k tile    (lane multiple of 128)
    n_rows = _round_up(n, tm)
    n_cols = _round_up(n, tk)

    # adj streams as bf16: exact for binary adjacency, halves the dominant
    # N^2 HBM traffic (the kernel is HBM-bound on adj).  Accumulation is f32.
    adj_p = jnp.zeros((n_rows, n_cols), jnp.bfloat16)
    adj_p = adj_p.at[:n, :n].set(adj.astype(jnp.bfloat16))
    xs_p = jnp.zeros((n_cols, f_in_p), jnp.float32).at[:n, :f_in].set(xs)
    d_p = jnp.zeros((n_rows, 1), jnp.float32).at[:n, 0].set(d_inv_sqrt)
    w_p = jnp.zeros((f_in_p, f_out_p), jnp.float32)
    w_p = w_p.at[:f_in, :f_out].set(jnp.transpose(weight).astype(jnp.float32))
    b_p = jnp.zeros((1, f_out_p), jnp.float32).at[0, :f_out].set(
        bias.astype(jnp.float32))

    grid = (n_rows // tm, n_cols // tk)

    out_p = pl.pallas_call(
        gcn_kernel,
        out_shape=jax.ShapeDtypeStruct((n_rows, f_out_p), jnp.float32),
        grid_spec=pltpu.PrefetchScalarGridSpec(
            num_scalar_prefetch=0,
            grid=grid,
            in_specs=[
                pl.BlockSpec((tm, tk), lambda i, k: (i, k)),           # adj
                pl.BlockSpec((tk, f_in_p), lambda i, k: (k, 0)),       # d * X
                pl.BlockSpec((tm, 1), lambda i, k: (i, 0)),            # d_inv_sqrt
                pl.BlockSpec((f_in_p, f_out_p), lambda i, k: (0, 0)),  # W^T
                pl.BlockSpec((1, f_out_p), lambda i, k: (0, 0)),       # bias
            ],
            out_specs=pl.BlockSpec((tm, f_out_p), lambda i, k: (i, 0)),
            scratch_shapes=[pltpu.VMEM((tm, f_in_p), jnp.float32)],
        ),
        compiler_params=pltpu.CompilerParams(
            dimension_semantics=("parallel", "arbitrary"),
            vmem_limit_bytes=48 * 1024 * 1024,
        ),
    )(adj_p, xs_p, d_p, w_p, b_p)

    return out_p[:n, :f_out]


def reference_forward(x, adj, weight, bias):
    deg = adj.sum(axis=1)
    d_inv_sqrt = jnp.where(deg > 0.0, deg ** -0.5, 0.0)
    a_norm = adj * d_inv_sqrt[:, None] * d_inv_sqrt[None, :]
    y = a_norm @ x
    return jnp.maximum(y @ weight.T + bias, 0.0)


if __name__ == "__main__":
    N, F_IN, F_OUT = 16, 8, 32

    key = jax.random.PRNGKey(0)
    k_x, k_a, k_w, k_b = jax.random.split(key, 4)

    x = jax.random.normal(k_x, (N, F_IN), dtype=jnp.float32)

    # Deterministic binary adjacency; zero out the last row/col to exercise
    # the isinf -> 0 path of degree^{-1/2}.
    adj = (jax.random.uniform(k_a, (N, N)) > 0.5).astype(jnp.float32)
    adj = adj.at[-1, :].set(0.0).at[:, -1].set(0.0)

    # nn.Linear default init: U(-1/sqrt(in_features), 1/sqrt(in_features))
    bound = 1.0 / (F_IN ** 0.5)
    weight = jax.random.uniform(k_w, (F_OUT, F_IN), minval=-bound, maxval=bound,
                                dtype=jnp.float32)
    bias = jax.random.uniform(k_b, (F_OUT,), minval=-bound, maxval=bound,
                              dtype=jnp.float32)

    out = gcn_cov_forward(x, adj, weight, bias)
    out = jax.block_until_ready(out)

    ref = reference_forward(x, adj, weight, bias)
    assert out.shape == (N, F_OUT)
    assert jnp.allclose(out, ref, atol=1e-5, rtol=1e-5)

    print("KERNEL_OK")
</pallas_src>

<mosaic_0001>
module attributes {stable_mosaic.version = 11 : i64} {
  func.func @gcn_kernel(%arg0: i32, %arg1: i32, %arg2: memref<16x128xbf16, #tpu.memory_space<vmem>>, %arg3: memref<128x128xf32, #tpu.memory_space<vmem>>, %arg4: memref<16x1xf32, #tpu.memory_space<vmem>>, %arg5: memref<128x128xf32, #tpu.memory_space<vmem>>, %arg6: memref<1x128xf32, #tpu.memory_space<vmem>>, %arg7: memref<16x128xf32, #tpu.memory_space<vmem>>, %arg8: memref<16x128xf32, #tpu.memory_space<vmem>>) attributes {dimension_semantics = [#tpu.dimension_semantics<parallel>, #tpu.dimension_semantics<arbitrary>], iteration_bounds = array<i64: 1, 1>, scalar_prefetch = 0 : i64, scratch_operands = 1 : i64, tpu.core_type = #tpu.core_type<tc>, window_params = [{transform_indices = @transform_0, window_bounds = array<i64: 16, 128>}, {transform_indices = @transform_1, window_bounds = array<i64: 128, 128>}, {transform_indices = @transform_2, window_bounds = array<i64: 16, 1>}, {pipeline_mode = #tpu.pipeline_mode<synchronous>, transform_indices = @transform_3, window_bounds = array<i64: 128, 128>}, {pipeline_mode = #tpu.pipeline_mode<synchronous>, transform_indices = @transform_4, window_bounds = array<i64: 1, 128>}, {transform_indices = @transform_5, window_bounds = array<i64: 16, 128>}]} {
    %c0_i32 = arith.constant 0 : i32
    %0 = arith.cmpi eq, %arg1, %c0_i32 : i32
    %1 = arith.extui %0 : i1 to i32
    %c0_i32_0 = arith.constant 0 : i32
    %2 = arith.cmpi ne, %1, %c0_i32_0 : i32
    scf.if %2 {
      %cst_10 = arith.constant 0.000000e+00 : f32
      %13 = vector.broadcast %cst_10 : f32 to vector<16x128xf32>
      %c0_11 = arith.constant 0 : index
      %c0_12 = arith.constant 0 : index
      %14 = vector.load %arg8[%c0_11, %c0_12] : memref<16x128xf32, #tpu.memory_space<vmem>>, vector<16x128xf32>
      tpu.vector_store %arg8[%c0_11, %c0_12], %13 {strides = array<i32>} : memref<16x128xf32, #tpu.memory_space<vmem>>, vector<16x128xf32>,
    } else {
    }
    %c0 = arith.constant 0 : index
    %c0_1 = arith.constant 0 : index
    %3 = vector.load %arg8[%c0, %c0_1] : memref<16x128xf32, #tpu.memory_space<vmem>>, vector<16x128xf32>
    %c0_2 = arith.constant 0 : index
    %c0_3 = arith.constant 0 : index
    %4 = vector.load %arg2[%c0_2, %c0_3] : memref<16x128xbf16, #tpu.memory_space<vmem>>, vector<16x128xbf16>
    %5 = arith.extf %4 : vector<16x128xbf16> to vector<16x128xf32>
    %c0_4 = arith.constant 0 : index
    %c0_5 = arith.constant 0 : index
    %6 = vector.load %arg3[%c0_4, %c0_5] : memref<128x128xf32, #tpu.memory_space<vmem>>, vector<128x128xf32>
    %cst = arith.constant dense<0.000000e+00> : vector<16x128xf32>
    %7 = tpu.matmul %5, %6, %cst {dimension_numbers = #tpu.dot_dimension_numbers<[1], [0], [0], [1], [0, 0, 1, 1], [], []>} : vector<16x128xf32>, vector<128x128xf32>, vector<16x128xf32> -> vector<16x128xf32>
    %8 = arith.addf %3, %7 : vector<16x128xf32>
    %c0_6 = arith.constant 0 : index
    %c0_7 = arith.constant 0 : index
    %9 = vector.load %arg8[%c0_6, %c0_7] : memref<16x128xf32, #tpu.memory_space<vmem>>, vector<16x128xf32>
    tpu.vector_store %arg8[%c0_6, %c0_7], %8 {strides = array<i32>} : memref<16x128xf32, #tpu.memory_space<vmem>>, vector<16x128xf32>,
    %c0_i32_8 = arith.constant 0 : i32
    %10 = arith.cmpi eq, %arg1, %c0_i32_8 : i32
    %11 = arith.extui %10 : i1 to i32
    %c0_i32_9 = arith.constant 0 : i32
    %12 = arith.cmpi ne, %11, %c0_i32_9 : i32
    scf.if %12 {
      %c0_10 = arith.constant 0 : index
      %c0_11 = arith.constant 0 : index
      %13 = vector.load %arg8[%c0_10, %c0_11] : memref<16x128xf32, #tpu.memory_space<vmem>>, vector<16x128xf32>
      %c0_12 = arith.constant 0 : index
      %c0_13 = arith.constant 0 : index
      %14 = vector.load %arg4[%c0_12, %c0_13] : memref<16x1xf32, #tpu.memory_space<vmem>>, vector<16x1xf32>
      %15 = vector.broadcast %14 : vector<16x1xf32> to vector<16x128xf32>
      %16 = arith.mulf %13, %15 : vector<16x128xf32>
      %c0_14 = arith.constant 0 : index
      %c0_15 = arith.constant 0 : index
      %17 = vector.load %arg5[%c0_14, %c0_15] : memref<128x128xf32, #tpu.memory_space<vmem>>, vector<128x128xf32>
      %cst_16 = arith.constant dense<0.000000e+00> : vector<16x128xf32>
      %18 = tpu.matmul %16, %17, %cst_16 {dimension_numbers = #tpu.dot_dimension_numbers<[1], [0], [0], [1], [0, 0, 1, 1], [], []>} : vector<16x128xf32>, vector<128x128xf32>, vector<16x128xf32> -> vector<16x128xf32>
      %c0_17 = arith.constant 0 : index
      %c0_18 = arith.constant 0 : index
      %19 = vector.load %arg6[%c0_17, %c0_18] : memref<1x128xf32, #tpu.memory_space<vmem>>, vector<1x128xf32>
      %20 = vector.broadcast %19 : vector<1x128xf32> to vector<16x128xf32>
      %21 = arith.addf %18, %20 : vector<16x128xf32>
      %cst_19 = arith.constant 0.000000e+00 : f32
      %22 = vector.broadcast %cst_19 : f32 to vector<16x128xf32>
      %23 = arith.maximumf %21, %22 : vector<16x128xf32>
      %c0_20 = arith.constant 0 : index
      %c0_21 = arith.constant 0 : index
      %24 = vector.load %arg7[%c0_20, %c0_21] : memref<16x128xf32, #tpu.memory_space<vmem>>, vector<16x128xf32>
      tpu.vector_store %arg7[%c0_20, %c0_21], %23 {strides = array<i32>} : memref<16x128xf32, #tpu.memory_space<vmem>>, vector<16x128xf32>,
    } else {
    }
    return
  }
  func.func @transform_0(%arg0: i32, %arg1: i32) -> (i32, i32) {
    %c0_i32 = arith.constant 0 : i32
    return %arg0, %arg1 : i32, i32
  }
  func.func @transform_1(%arg0: i32, %arg1: i32) -> (i32, i32) {
    %c0_i32 = arith.constant 0 : i32
    %c0_i32_0 = arith.constant 0 : i32
    return %arg1, %c0_i32 : i32, i32
  }
  func.func @transform_2(%arg0: i32, %arg1: i32) -> (i32, i32) {
    %c0_i32 = arith.constant 0 : i32
    %c0_i32_0 = arith.constant 0 : i32
    return %arg0, %c0_i32 : i32, i32
  }
  func.func @transform_3(%arg0: i32, %arg1: i32) -> (i32, i32) {
    %c0_i32 = arith.constant 0 : i32
    %c0_i32_0 = arith.constant 0 : i32
    %c0_i32_1 = arith.constant 0 : i32
    return %c0_i32, %c0_i32_0 : i32, i32
  }
  func.func @transform_4(%arg0: i32, %arg1: i32) -> (i32, i32) {
    %c0_i32 = arith.constant 0 : i32
    %c0_i32_0 = arith.constant 0 : i32
    %c0_i32_1 = arith.constant 0 : i32
    return %c0_i32, %c0_i32_0 : i32, i32
  }
  func.func @transform_5(%arg0: i32, %arg1: i32) -> (i32, i32) {
    %c0_i32 = arith.constant 0 : i32
    %c0_i32_0 = arith.constant 0 : i32
    return %arg0, %c0_i32 : i32, i32
  }
}

</mosaic_0001>

<bundles_post_ra>
// kernel: tpu_custom_call.1
= control target key start
LH: loop header
LB: loop body
LE: loop exit
PB: predicated region body
PF: predicated region fallthrough
CT: control target
= control target key end

     0   :  { %10 = vsyncpa [#allocation4], 0  ;;  %s382_s0 = inlined_call_operand.vmem [shape: bf16[16,128], index: 0, kind: input, shape index: {}]   ;;  %s383_s1 = inlined_call_operand.hbm [shape: f32[128,128], index: 1, kind: input, shape index: {}]   ;;  %s384_s2 = inlined_call_operand.vmem [shape: f32[16,1], index: 2, kind: input, shape index: {}]   ;;  %s385_s3 = inlined_call_operand.hbm [shape: f32[128,128], index: 3, kind: input, shape index: {}]   ;;  %s386_s4 = inlined_call_operand.vmem [shape: f32[1,128], index: 4, kind: input, shape index: {}]   ;;  %s387_s5 = inlined_call_operand.hbm [shape: f32[16,128], index: 5, kind: output, shape index: {}]  }
   0x1   :  { %11 = vsyncpa [#allocation7], 0 }
   0x2   :  { %12 = vsyncpa [#allocation5], 0  ;;  %s19_s20 = sshll.u32 %s383_s1, 4  ;;  %s316_s21 = smov [#allocation3]   ;;  %s20_s20 = int_to_ptr.hbm [resolvable:$true] %s19_s20 }
   0x3   :  { %s21_s22 = sshll.u32 %s316_s21, 4  ;;  %s34_s25 = sshll.u32 %s385_s3, 4  ;;  %s22_s22 = int_to_ptr.vmem [resolvable:$true] %s21_s22  ;;  %s35_s25 = int_to_ptr.hbm [resolvable:$true] %s34_s25 }
   0x4   :  { %s317_s26 = smov 128   ;;  %s318_s27 = smov 8  }
   0x5   :  { %27 = dma.hbm_to_vmem [thread:$0]  %s20_s20, 2048, %s22_s22, [#allocation4], %s317_s26, %s317_s26, %s318_s27  }
   0x6   :  { %s319_s28 = smov [#allocation6]  }
   0x7   :  { %s36_s29 = sshll.u32 %s319_s28, 4  ;;  %s37_s29 = int_to_ptr.vmem [resolvable:$true] %s36_s29 }
   0x8   :  { %42 = dma.hbm_to_vmem [thread:$0]  %s35_s25, 2048, %s37_s29, [#allocation7], %s317_s26, %s317_s26, %s318_s27  }
   0x9   :  { %310 = dma.done.wait [#allocation4], 2048  }
   0xa   :  { %311 = vsyncadd [#allocation4], 4294965248 }
   0xb   :  { %312 = dma.done.wait [#allocation7], 2048  }
   0xc   :  { %313 = vsyncadd [#allocation7], 4294965248  ;;  %v80_v0 = vld [vmem:[#allocation3 + $0x78] sm:$0xff]  ;;  %v79_v1 = vld [vmem:[#allocation3 + $0x70] sm:$0xff]  ;;  %v320_v3 = vmov 0   ;;  %s321_s9 = smov [#allocation8]  }
   0xd   :  { %198 = vmatpush.msra.mxu2 %v80_v0  ;;  %81 = vmatpush.msra.mxu0 %v80_v0  ;;  %v78_v2 = vld [vmem:[#allocation3 + $0x68] sm:$0xff]  ;;  %v77_v4 = vld [vmem:[#allocation3 + $0x60] sm:$0xff]  ;;  %v76_v6 = vld [vmem:[#allocation3 + $0x58] sm:$0xff]  ;;  %s178_s10 = sshll.u32 %s321_s9, 4  ;;  %s180_s13 = sshll.u32 %s387_s5, 4  ;;  %s179_s10 = int_to_ptr.vmem [resolvable:$true] %s178_s10  ;;  %s181_s13 = int_to_ptr.hbm [resolvable:$true] %s180_s13 }
   0xe   :  { %236 = vset.pattern.permute.xlu0 %v320_v3  ;;  %v114_v5 = vld [vmem:[%s384_s2 + $0x8] sm:$0xff]  ;;  %v142_v7 = vld [vmem:[#allocation6 + $0x78] sm:$0xff]  ;;  %v141_v8 = vld [vmem:[#allocation6 + $0x70] sm:$0xff] }
   0xf   :  { %199 = vmatpush.msra.mxu2 %v79_v1  ;;  %82 = vmatpush.msra.mxu0 %v79_v1  ;;  %v75_v9 = vld [vmem:[#allocation3 + $0x50] sm:$0xff]  ;;  %v140_v10 = vld [vmem:[#allocation6 + $0x68] sm:$0xff]  ;;  %v113_v12 = vld [vmem:[%s384_s2] sm:$0xff] }
  0x10   :  { %122 = vperm.xlu0 %236, %v114_v5   ;;  %147 = vmatpush.msra.mxu1 %v142_v7  ;;  %v74_v11 = vld [vmem:[#allocation3 + $0x48] sm:$0xff]  ;;  %v139_v13 = vld [vmem:[#allocation6 + $0x60] sm:$0xff]  ;;  %v138_v15 = vld [vmem:[#allocation6 + $0x58] sm:$0xff] }
  0x11   :  { %200 = vmatpush.msra.mxu2 %v78_v2  ;;  %83 = vmatpush.msra.mxu0 %v78_v2  ;;  %v73_v14 = vld [vmem:[#allocation3 + $0x40] sm:$0xff]  ;;  %v72_v16 = vld [vmem:[#allocation3 + $0x38] sm:$0xff]  ;;  %v137_v17 = vld [vmem:[#allocation6 + $0x50] sm:$0xff] }
  0x12   :  { %214 = vmatpush.msra.mxu3 %v142_v7  ;;  %148 = vmatpush.msra.mxu1 %v141_v8  ;;  %v71_v18 = vld [vmem:[#allocation3 + $0x30] sm:$0xff]  ;;  %v136_v19 = vld [vmem:[#allocation6 + $0x48] sm:$0xff]  ;;  %v135_v21 = vld [vmem:[#allocation6 + $0x40] sm:$0xff] }
  0x13   :  { %201 = vmatpush.msra.mxu2 %v77_v4  ;;  %84 = vmatpush.msra.mxu0 %v77_v4  ;;  %v70_v20 = vld [vmem:[#allocation3 + $0x28] sm:$0xff]  ;;  %v69_v22 = vld [vmem:[#allocation3 + $0x20] sm:$0xff]  ;;  %v134_v23 = vld [vmem:[#allocation6 + $0x38] sm:$0xff] }
  0x14   :  { %215 = vmatpush.msra.mxu3 %v141_v8  ;;  %149 = vmatpush.msra.mxu1 %v140_v10  ;;  %v68_v24 = vld [vmem:[#allocation3 + $0x18] sm:$0xff]  ;;  %v133_v25 = vld [vmem:[#allocation6 + $0x30] sm:$0xff]  ;;  %v195_v27 = vld [vmem:[%s382_s0] sm:$0xff]  }
  0x15   :  { %202 = vmatpush.msra.mxu2 %v76_v6  ;;  %85 = vmatpush.msra.mxu0 %v76_v6  ;;  %v67_v26 = vld [vmem:[#allocation3 + $0x10] sm:$0xff]  ;;  %v132_v28 = vld [vmem:[#allocation6 + $0x28] sm:$0xff]  ;;  %v65_v30 = vld [vmem:[#allocation3] sm:$0xff]  ;;  %v197_v31 = vunpack.c.h.bf16 %v195_v27  ;;  %v196_v32 = vunpack.c.l.bf16 %v195_v27 }
  0x16   :  { %216 = vmatpush.msra.mxu3 %v140_v10  ;;  %150 = vmatpush.msra.mxu1 %v139_v13  ;;  %v66_v29 = vld [vmem:[#allocation3 + $0x8] sm:$0xff]  ;;  %v131_v33 = vld [vmem:[#allocation6 + $0x20] sm:$0xff]  ;;  %v130_v34 = vld [vmem:[#allocation6 + $0x18] sm:$0xff] }
  0x17   :  { %203 = vmatpush.msra.mxu2 %v75_v9  ;;  %86 = vmatpush.msra.mxu0 %v75_v9  ;;  %v129_v35 = vld [vmem:[#allocation6 + $0x10] sm:$0xff]  ;;  %v128_v36 = vld [vmem:[#allocation6 + $0x8] sm:$0xff]  ;;  %v127_v37 = vld [vmem:[#allocation6] sm:$0xff] }
  0x18   :  { %117 = vperm.xlu0 %236, %v113_v12   ;;  %217 = vmatpush.msra.mxu3 %v139_v13  ;;  %v237_v44 = vld [vmem:[%s386_s4] ss:$0 sm:$0xff] }
  0x19   :  { %204 = vmatpush.msra.mxu2 %v74_v11  ;;  %87 = vmatpush.msra.mxu0 %v74_v11 }
  0x1a   :  { %151 = vmatpush.msra.mxu1 %v138_v15  ;;  %218 = vmatpush.msra.mxu3 %v138_v15 }
  0x1b   :  { %205 = vmatpush.msra.mxu2 %v73_v14  ;;  %88 = vmatpush.msra.mxu0 %v73_v14 }
  0x1c   :  { %152 = vmatpush.msra.mxu1 %v137_v17  ;;  %219 = vmatpush.msra.mxu3 %v137_v17 }
  0x1d   :  { %206 = vmatpush.msra.mxu2 %v72_v16  ;;  %89 = vmatpush.msra.mxu0 %v72_v16 }
  0x1e   :  { %153 = vmatpush.msra.mxu1 %v136_v19  ;;  %220 = vmatpush.msra.mxu3 %v136_v19 }
  0x1f   :  { %207 = vmatpush.msra.mxu2 %v71_v18  ;;  %90 = vmatpush.msra.mxu0 %v71_v18 }
  0x20   :  { %154 = vmatpush.msra.mxu1 %v135_v21  ;;  %221 = vmatpush.msra.mxu3 %v135_v21 }
  0x21   :  { %208 = vmatpush.msra.mxu2 %v70_v20  ;;  %91 = vmatpush.msra.mxu0 %v70_v20 }
  0x22   :  { %155 = vmatpush.msra.mxu1 %v134_v23  ;;  %222 = vmatpush.msra.mxu3 %v134_v23 }
  0x23   :  { %209 = vmatpush.msra.mxu2 %v69_v22  ;;  %92 = vmatpush.msra.mxu0 %v69_v22 }
  0x24   :  { %156 = vmatpush.msra.mxu1 %v133_v25  ;;  %223 = vmatpush.msra.mxu3 %v133_v25 }
  0x25   :  { %210 = vmatpush.msra.mxu2 %v68_v24  ;;  %93 = vmatpush.msra.mxu0 %v68_v24 }
  0x26   :  { %157 = vmatpush.msra.mxu1 %v132_v28  ;;  %224 = vmatpush.msra.mxu3 %v132_v28 }
  0x27   :  { %211 = vmatpush.msra.mxu2 %v67_v26  ;;  %94 = vmatpush.msra.mxu0 %v67_v26 }
  0x28   :  { %158 = vmatpush.msra.mxu1 %v131_v33  ;;  %225 = vmatpush.msra.mxu3 %v131_v33 }
  0x29   :  { %212 = vmatpush.msra.mxu2 %v66_v29  ;;  %95 = vmatpush.msra.mxu0 %v66_v29 }
  0x2a   :  { %159 = vmatpush.msra.mxu1 %v130_v34  ;;  %226 = vmatpush.msra.mxu3 %v130_v34 }
  0x2b   :  { %213 = vmatpush.msra.mxu2 %v65_v30  ;;  %96 = vmatpush.msra.mxu0 %v65_v30 }
  0x2c   :  { %100 = vmatmul.f32.vlgmr.msra.gmra.mxu2 %v197_v31  ;;  %97 = vmatmul.f32.vlgmr.msra.gmra.mxu0 %v196_v32 }
  0x2d   :  { %160 = vmatpush.msra.mxu1 %v129_v35  ;;  %227 = vmatpush.msra.mxu3 %v129_v35 }
  0x2f   :  { %161 = vmatpush.msra.mxu1 %v128_v36  ;;  %228 = vmatpush.msra.mxu3 %v128_v36 }
  0x31   :  { %162 = vmatpush.msra.mxu1 %v127_v37  ;;  %229 = vmatpush.msra.mxu3 %v127_v37 }
  0x82   :  { %v123_v38 = vpop.permute.xlu0 %122 }
  0x8a   :  { %v118_v39 = vpop.permute.xlu0 %117 }
  0xa9   :  { %v98_v40 = vpop.f32.mrf.mxu0 }
  0xaa   :  { %v125_v41 = vmul.f32 %v118_v39, %v98_v40 }
  0xac   :  { %163 = vmatmul.f32.vlgmr.msra.gmra.mxu1 %v125_v41 }
  0xaf   :  { %v101_v42 = vpop.f32.mrf.mxu2 }
  0xb0   :  { %v126_v43 = vmul.f32 %v123_v38, %v101_v42 }
  0xb2   :  { %166 = vmatmul.f32.vlgmr.msra.gmra.mxu3 %v126_v43 }
 0x129   :  { %v164_v45 = vpop.f32.mrf.mxu1 }
 0x12a   :  { %v165_v46 = vadd.f32 %v237_v44, %v164_v45 }
 0x12c   :  { %v170_v47 = vmax.f32 %v165_v46, 0.0 }
 0x12e   :  { %172 = vst [vmem:[#allocation8] sm:$0xff] %v170_v47 }
 0x135   :  { %v167_v48 = vpop.f32.mrf.mxu3 }
 0x136   :  { %v168_v49 = vadd.f32 %v237_v44, %v167_v48 }
 0x138   :  { %v171_v50 = vmax.f32 %v168_v49, 0.0 }
 0x13a   :  { %173 = vst [vmem:[#allocation8 + $0x8] sm:$0xff] %v171_v50 }
 0x13b   :  { %186 = dma.vmem_to_hbm [thread:$0]  %s179_s10, 256, %s181_s13, [#allocation5], %s317_s26, %s317_s26, %s318_s27  }
 0x13c   :  { %314 = dma.done.wait [#allocation5], 256  }
 0x13d   :  { %315 = vsyncadd [#allocation5], 4294967040 }
 0x13e   :  { %191 = vsyncpa [#allocation4], 1 }
 0x13f   :  { %192 = vsyncpa [#allocation7], 1 }
 0x140   :  { %193 = vsyncpa [#allocation5], 1 }

</bundles_post_ra>
